<compile_context>
chip_gen: v7x
topology: tpu7x:2x2x1
jax: 0.10.0
libtpu: 0.0.40
codegen_flags: <defaults>
</compile_context>

<pallas_src>
import functools

import jax
import jax.numpy as jnp
from jax.experimental import pallas as pl
from jax.experimental.pallas import tpu as pltpu

LANE = 128  # TPU lane width


def _round_up(v, m):
    return ((v + m - 1) // m) * m


def _pad2d(a, rows, cols):
    return jnp.pad(a, ((0, rows - a.shape[0]), (0, cols - a.shape[1])))


def sage_layer_kernel(a_ref, x_full_ref, x_self_ref, w_ref, b_ref, o_ref, *, apply_relu):
    """One SAGEConv layer for a tile of `tm` target nodes.

    a_ref      : (tm, Np)          row-normalized adjacency rows for this tile
    x_full_ref : (Np, Fin_p)       full node features (needed for neighbor agg)
    x_self_ref : (tm, Fin_p)       this tile's own features (tiled BlockSpec)
    w_ref      : (2*Fin_p, Fout_p) concat([W_l; W_r], axis=0)
    b_ref      : (1, Fout_p)       bias (f32)
    o_ref      : (tm, Fout_p)      output tile
    """
    # Mean-aggregate neighbor features on the MXU, f32 accumulation.
    agg = jnp.dot(a_ref[...], x_full_ref[...], preferred_element_type=jnp.float32)

    # Fused weight matmul: [agg | x_self] @ [W_l; W_r]  (one MXU push, K=2*Fin_p).
    lhs = jnp.concatenate([agg.astype(a_ref.dtype), x_self_ref[...]], axis=1)
    out = jnp.dot(lhs, w_ref[...], preferred_element_type=jnp.float32) + b_ref[...]

    if apply_relu:
        out = jnp.maximum(out, 0.0)
    o_ref[...] = out.astype(o_ref.dtype)


def sage_conv_pallas(x, a_norm, w_cat, b, *, apply_relu, tm, out_dtype):
    """out = relu?( (A @ x) @ W_l + x @ W_r + b ), tiled over padded node rows.

    x      : (Np, Fin_p)       padded node features (compute dtype)
    a_norm : (Np, Np)          padded row-normalized adjacency (compute dtype)
    w_cat  : (2*Fin_p, Fout_p) concat([W_l; W_r]) zero-padded (compute dtype)
    b      : (1, Fout_p)       zero-padded bias (f32)
    """
    n_pad, f_in_p = x.shape
    f_out_p = w_cat.shape[1]
    assert n_pad % tm == 0

    kernel = functools.partial(sage_layer_kernel, apply_relu=apply_relu)
    return pl.pallas_call(
        kernel,
        out_shape=jax.ShapeDtypeStruct((n_pad, f_out_p), out_dtype),
        grid=(n_pad // tm,),
        in_specs=[
            pl.BlockSpec((tm, n_pad), lambda i: (i, 0)),        # adjacency rows for tile
            pl.BlockSpec((n_pad, f_in_p), lambda i: (0, 0)),    # full X (resident)
            pl.BlockSpec((tm, f_in_p), lambda i: (i, 0)),       # self features for tile
            pl.BlockSpec((2 * f_in_p, f_out_p), lambda i: (0, 0)),
            pl.BlockSpec((1, f_out_p), lambda i: (0, 0)),
        ],
        out_specs=pl.BlockSpec((tm, f_out_p), lambda i: (i, 0)),
        compiler_params=pltpu.CompilerParams(
            dimension_semantics=("parallel",),     # megacore-shardable on v7x
            vmem_limit_bytes=48 * 1024 * 1024,     # > v5e's 16 MiB default, < v7x's 64 MiB
        ),
    )(a_norm, x, x, w_cat, b)


def build_normalized_adjacency(edge_index, num_nodes):
    """Dense row-normalized adjacency: A[i, j] = 1/in_deg(i) per edge j->i.

    Matches PyG scatter-mean semantics (zero rows for isolated nodes, duplicate
    edges counted in the denominator). Glue, not hot-path.
    """
    src = edge_index[0]
    dst = edge_index[1]
    counts = jnp.zeros((num_nodes, num_nodes), jnp.float32).at[dst, src].add(1.0)
    deg = counts.sum(axis=1, keepdims=True)
    return jnp.where(deg > 0, counts / jnp.maximum(deg, 1.0), 0.0)


class GNNEncoderPallas:
    """Two SAGEConv layers: conv1 -> relu -> conv2 (PyG SAGEConv semantics)."""

    def __init__(self, in_channels, hidden_channels, out_channels, key,
                 compute_dtype=jnp.bfloat16, tm=128):
        k = jax.random.split(key, 6)
        s1 = 1.0 / jnp.sqrt(jnp.float32(in_channels))
        s2 = 1.0 / jnp.sqrt(jnp.float32(hidden_channels))
        # conv1: lin_l (neighbor agg, with bias), lin_r (root, no bias)
        self.w_l1 = jax.random.uniform(k[0], (in_channels, hidden_channels), jnp.float32, -s1, s1)
        self.w_r1 = jax.random.uniform(k[1], (in_channels, hidden_channels), jnp.float32, -s1, s1)
        self.b1 = jax.random.uniform(k[2], (hidden_channels,), jnp.float32, -s1, s1)
        # conv2
        self.w_l2 = jax.random.uniform(k[3], (hidden_channels, out_channels), jnp.float32, -s2, s2)
        self.w_r2 = jax.random.uniform(k[4], (hidden_channels, out_channels), jnp.float32, -s2, s2)
        self.b2 = jax.random.uniform(k[5], (out_channels,), jnp.float32, -s2, s2)
        self.compute_dtype = compute_dtype
        self.tm = tm  # row tile; 128 fills one MXU M-dim (use 256 on v6e/v7x for big N)

    def __call__(self, x, edge_index):
        n, f_in = x.shape
        hid = self.w_l1.shape[1]
        f_out = self.w_l2.shape[1]
        cdt = self.compute_dtype
        tm = self.tm

        # Lane-dense padded dims (multiples of 128); node rows padded to tile size.
        n_pad = _round_up(max(n, tm), tm)
        f_in_p = _round_up(f_in, LANE)
        hid_p = _round_up(hid, LANE)
        f_out_p = _round_up(f_out, LANE)

        a = build_normalized_adjacency(edge_index, n)
        a_pad = _pad2d(a, n_pad, n_pad).astype(cdt)       # zero rows/cols for padded nodes
        x_pad = _pad2d(x, n_pad, f_in_p).astype(cdt)

        # Concat + zero-pad weights once; padded lanes stay exactly zero so they
        # cannot leak into layer 2 (bias padded with zeros -> padded h cols == 0).
        w1 = jnp.concatenate(
            [_pad2d(self.w_l1, f_in_p, hid_p), _pad2d(self.w_r1, f_in_p, hid_p)], axis=0
        ).astype(cdt)
        b1 = jnp.pad(self.b1, (0, hid_p - hid)).reshape(1, hid_p).astype(jnp.float32)
        w2 = jnp.concatenate(
            [_pad2d(self.w_l2, hid_p, f_out_p), _pad2d(self.w_r2, hid_p, f_out_p)], axis=0
        ).astype(cdt)
        b2 = jnp.pad(self.b2, (0, f_out_p - f_out)).reshape(1, f_out_p).astype(jnp.float32)

        h = sage_conv_pallas(x_pad, a_pad, w1, b1, apply_relu=True, tm=tm, out_dtype=cdt)
        out = sage_conv_pallas(h, a_pad, w2, b2, apply_relu=False, tm=tm,
                               out_dtype=jnp.float32)
        return out[:n, :f_out]

    def reference(self, x, edge_index):
        """Pure-JAX f32 reference of the same math (for correctness checking)."""
        n = x.shape[0]
        a = build_normalized_adjacency(edge_index, n)
        h = jnp.maximum(a @ x @ self.w_l1 + x @ self.w_r1 + self.b1, 0.0)
        return a @ h @ self.w_l2 + h @ self.w_r2 + self.b2


if __name__ == "__main__":
    key = jax.random.PRNGKey(0)
    k_x, k_src, k_dst, k_params = jax.random.split(key, 4)

    num_nodes = 16
    in_channels = 8
    hidden_channels = 32
    out_channels = 16
    num_edges = 48

    x = jax.random.normal(k_x, (num_nodes, in_channels), jnp.float32)
    src = jax.random.randint(k_src, (num_edges,), 0, num_nodes, jnp.int32)
    dst = jax.random.randint(k_dst, (num_edges,), 0, num_nodes, jnp.int32)
    edge_index = jnp.stack([src, dst], axis=0)  # [2, E]

    model = GNNEncoderPallas(in_channels, hidden_channels, out_channels, k_params)

    ref = jax.block_until_ready(model.reference(x, edge_index))

    # Fast path: bf16 MXU inputs, f32 accumulation.
    out_bf16 = jax.block_until_ready(model(x, edge_index))
    assert out_bf16.shape == (num_nodes, out_channels)
    assert jnp.allclose(out_bf16, ref, atol=7.5e-2, rtol=5e-2), float(
        jnp.max(jnp.abs(out_bf16 - ref)))

    # Exactness path: same kernels in f32, tight tolerance against the reference.
    model.compute_dtype = jnp.float32
    out_f32 = jax.block_until_ready(model(x, edge_index))
    assert jnp.allclose(out_f32, ref, atol=1e-5, rtol=1e-5)

    print("KERNEL_OK")
</pallas_src>

<mosaic_0001>
module attributes {stable_mosaic.version = 11 : i64} {
  func.func @sage_layer_kernel(%arg0: i32, %arg1: memref<128x128xbf16, #tpu.memory_space<vmem>>, %arg2: memref<128x128xbf16, #tpu.memory_space<vmem>>, %arg3: memref<128x128xbf16, #tpu.memory_space<vmem>>, %arg4: memref<256x128xbf16, #tpu.memory_space<vmem>>, %arg5: memref<1x128xf32, #tpu.memory_space<vmem>>, %arg6: memref<128x128xbf16, #tpu.memory_space<vmem>>) attributes {dimension_semantics = [#tpu.dimension_semantics<parallel>], iteration_bounds = array<i64: 1>, scalar_prefetch = 0 : i64, scratch_operands = 0 : i64, tpu.core_type = #tpu.core_type<tc>, window_params = [{transform_indices = @transform_0, window_bounds = array<i64: 128, 128>}, {pipeline_mode = #tpu.pipeline_mode<synchronous>, transform_indices = @transform_1, window_bounds = array<i64: 128, 128>}, {transform_indices = @transform_2, window_bounds = array<i64: 128, 128>}, {pipeline_mode = #tpu.pipeline_mode<synchronous>, transform_indices = @transform_3, window_bounds = array<i64: 256, 128>}, {pipeline_mode = #tpu.pipeline_mode<synchronous>, transform_indices = @transform_4, window_bounds = array<i64: 1, 128>}, {transform_indices = @transform_5, window_bounds = array<i64: 128, 128>}]} {
    %c0 = arith.constant 0 : index
    %c0_0 = arith.constant 0 : index
    %0 = vector.load %arg1[%c0, %c0_0] : memref<128x128xbf16, #tpu.memory_space<vmem>>, vector<128x128xbf16>
    %c0_1 = arith.constant 0 : index
    %c0_2 = arith.constant 0 : index
    %1 = vector.load %arg2[%c0_1, %c0_2] : memref<128x128xbf16, #tpu.memory_space<vmem>>, vector<128x128xbf16>
    %cst = arith.constant dense<0.000000e+00> : vector<128x128xf32>
    %2 = tpu.matmul %0, %1, %cst {dimension_numbers = #tpu.dot_dimension_numbers<[1], [0], [0], [1], [0, 0, 1, 1], [], []>} : vector<128x128xbf16>, vector<128x128xbf16>, vector<128x128xf32> -> vector<128x128xf32>
    %3 = arith.truncf %2 : vector<128x128xf32> to vector<128x128xbf16>
    %c0_3 = arith.constant 0 : index
    %c0_4 = arith.constant 0 : index
    %4 = vector.load %arg3[%c0_3, %c0_4] : memref<128x128xbf16, #tpu.memory_space<vmem>>, vector<128x128xbf16>
    %5 = tpu.concatenate %3, %4 in 1 : vector<128x128xbf16>, vector<128x128xbf16> -> vector<128x256xbf16>
    %c0_5 = arith.constant 0 : index
    %c0_6 = arith.constant 0 : index
    %6 = vector.load %arg4[%c0_5, %c0_6] : memref<256x128xbf16, #tpu.memory_space<vmem>>, vector<256x128xbf16>
    %cst_7 = arith.constant dense<0.000000e+00> : vector<128x128xf32>
    %7 = tpu.matmul %5, %6, %cst_7 {dimension_numbers = #tpu.dot_dimension_numbers<[1], [0], [0], [1], [0, 0, 1, 1], [], []>} : vector<128x256xbf16>, vector<256x128xbf16>, vector<128x128xf32> -> vector<128x128xf32>
    %c0_8 = arith.constant 0 : index
    %c0_9 = arith.constant 0 : index
    %8 = vector.load %arg5[%c0_8, %c0_9] : memref<1x128xf32, #tpu.memory_space<vmem>>, vector<1x128xf32>
    %9 = vector.broadcast %8 : vector<1x128xf32> to vector<128x128xf32>
    %10 = arith.addf %7, %9 : vector<128x128xf32>
    %cst_10 = arith.constant 0.000000e+00 : f32
    %11 = vector.broadcast %cst_10 : f32 to vector<128x128xf32>
    %12 = arith.maximumf %10, %11 : vector<128x128xf32>
    %13 = arith.truncf %12 : vector<128x128xf32> to vector<128x128xbf16>
    %c0_11 = arith.constant 0 : index
    %c0_12 = arith.constant 0 : index
    %14 = vector.load %arg6[%c0_11, %c0_12] : memref<128x128xbf16, #tpu.memory_space<vmem>>, vector<128x128xbf16>
    tpu.vector_store %arg6[%c0_11, %c0_12], %13 {strides = array<i32>} : memref<128x128xbf16, #tpu.memory_space<vmem>>, vector<128x128xbf16>,
    return
  }
  func.func @transform_0(%arg0: i32) -> (i32, i32) {
    %c0_i32 = arith.constant 0 : i32
    %c0_i32_0 = arith.constant 0 : i32
    return %arg0, %c0_i32 : i32, i32
  }
  func.func @transform_1(%arg0: i32) -> (i32, i32) {
    %c0_i32 = arith.constant 0 : i32
    %c0_i32_0 = arith.constant 0 : i32
    %c0_i32_1 = arith.constant 0 : i32
    return %c0_i32, %c0_i32_0 : i32, i32
  }
  func.func @transform_2(%arg0: i32) -> (i32, i32) {
    %c0_i32 = arith.constant 0 : i32
    %c0_i32_0 = arith.constant 0 : i32
    return %arg0, %c0_i32 : i32, i32
  }
  func.func @transform_3(%arg0: i32) -> (i32, i32) {
    %c0_i32 = arith.constant 0 : i32
    %c0_i32_0 = arith.constant 0 : i32
    %c0_i32_1 = arith.constant 0 : i32
    return %c0_i32, %c0_i32_0 : i32, i32
  }
  func.func @transform_4(%arg0: i32) -> (i32, i32) {
    %c0_i32 = arith.constant 0 : i32
    %c0_i32_0 = arith.constant 0 : i32
    %c0_i32_1 = arith.constant 0 : i32
    return %c0_i32, %c0_i32_0 : i32, i32
  }
  func.func @transform_5(%arg0: i32) -> (i32, i32) {
    %c0_i32 = arith.constant 0 : i32
    %c0_i32_0 = arith.constant 0 : i32
    return %arg0, %c0_i32 : i32, i32
  }
}

</mosaic_0001>

<bundles_post_ra>
// kernel: tpu_custom_call.1
= control target key start
LH: loop header
LB: loop body
LE: loop exit
PB: predicated region body
PF: predicated region fallthrough
CT: control target
= control target key end

     0   :  { %10 = vsyncpa [#allocation3], 0  ;;  %s1281_s0 = inlined_call_operand.hbm [shape: bf16[128,128], index: 0, kind: input, shape index: {}]   ;;  %s1282_s1 = inlined_call_operand.hbm [shape: bf16[128,128], index: 1, kind: input, shape index: {}]   ;;  %s1283_s2 = inlined_call_operand.hbm [shape: bf16[128,128], index: 2, kind: input, shape index: {}]   ;;  %s1284_s3 = inlined_call_operand.hbm [shape: bf16[256,128], index: 3, kind: input, shape index: {}]   ;;  %s1285_s4 = inlined_call_operand.vmem [shape: f32[1,128], index: 4, kind: input, shape index: {}]   ;;  %s1286_s5 = inlined_call_operand.hbm [shape: bf16[128,128], index: 5, kind: output, shape index: {}]  }
   0x1   :  { %11 = vsyncpa [#allocation6], 0 }
   0x2   :  { %12 = vsyncpa [#allocation9], 0 }
   0x3   :  { %13 = vsyncpa [#allocation4], 0  ;;  %s1134_s18 = smov [#allocation5]   ;;  %s1135_s20 = smov [#allocation2]  }
   0x4   :  { %s31_s19 = sshll.u32 %s1134_s18, 4  ;;  %s19_s21 = sshll.u32 %s1135_s20, 4  ;;  %s32_s19 = int_to_ptr.vmem [resolvable:$true] %s31_s19  ;;  %s1171_s21 = int_to_ptr.vmem [resolvable:$true] %s19_s21 }
   0x5   :  { %s1016_s24 = scalar_lea.hbm %s1282_s1, 1024 }
   0x6   :  { %p1017_p0 = scmp.ne.s32.totalorder %s1282_s1, %s1016_s24  ;;  %p1020_p1 = scmp.lt.u32.totalorder %s1016_s24, %s1282_s1 }
   0x8   :  { %p1022_p2 = pnand %p1020_p1, %p1017_p0 }
   0xa   :  { %1025 = shalt.err (!%p1022_p2)
}
   0xb   :  { %s1026_s29 = scalar_lea.vmem %s32_s19, 1024  ;;  %p1031_p4 = scmp.lt.s32.totalorder %s32_s19, %s32_s19 }
   0xc   :  { %p1027_p3 = scmp.ne.s32.totalorder %s32_s19, %s1026_s29  ;;  %p1032_p5 = scmp.lt.s32.totalorder %s1026_s29, %s1026_s29 }
   0xe   :  { %p1033_p6 = por %p1032_p5, %p1031_p4 }
  0x10   :  { %p1034_p7 = pnand %p1033_p6, %p1027_p3 }
  0x12   :  { %1037 = shalt.err (!%p1034_p7)
}
  0x13   :  { %s1136_s30 = smov 64   ;;  %s1137_s6 = smov 4  }
  0x14   :  { %37 = dma.hbm_to_vmem [thread:$0]  %s1282_s1, 1024, %s32_s19, [#allocation6], %s1136_s30, %s1136_s30, %s1137_s6  }
  0x15   :  { %s1038_s11 = scalar_lea.hbm %s1281_s0, 1024 }
  0x16   :  { %p1039_p8 = scmp.ne.s32.totalorder %s1281_s0, %s1038_s11  ;;  %p1042_p9 = scmp.lt.u32.totalorder %s1038_s11, %s1281_s0 }
  0x18   :  { %p1044_p10 = pnand %p1042_p9, %p1039_p8 }
  0x1a   :  { %1047 = shalt.err (!%p1044_p10)
}
  0x1b   :  { %s1048_s16 = scalar_lea.vmem %s1171_s21, 1024  ;;  %p1053_p12 = scmp.lt.s32.totalorder %s1171_s21, %s1171_s21 }
  0x1c   :  { %p1049_p11 = scmp.ne.s32.totalorder %s1171_s21, %s1048_s16  ;;  %p1054_p13 = scmp.lt.s32.totalorder %s1048_s16, %s1048_s16 }
  0x1e   :  { %p1055_p0 = por %p1054_p13, %p1053_p12 }
  0x20   :  { %p1056_p1 = pnand %p1055_p0, %p1049_p11 }
  0x22   :  { %1059 = shalt.err (!%p1056_p1)
}
  0x23   :  { %25 = dma.hbm_to_vmem [thread:$0]  %s1281_s0, 1024, %s1171_s21, [#allocation3], %s1136_s30, %s1136_s30, %s1137_s6  }
  0x24   :  { %s1138_s18 = smov [#allocation7]   ;;  %s1139_s20 = smov [#allocation8]  }
  0x25   :  { %s43_s19 = sshll.u32 %s1138_s18, 4  ;;  %s55_s22 = sshll.u32 %s1139_s20, 4  ;;  %s44_s19 = int_to_ptr.vmem [resolvable:$true] %s43_s19  ;;  %s1208_s22 = int_to_ptr.vmem [resolvable:$true] %s55_s22 }
  0x26   :  { %s1060_s25 = scalar_lea.hbm %s1283_s2, 1024 }
  0x27   :  { %p1061_p2 = scmp.ne.s32.totalorder %s1283_s2, %s1060_s25  ;;  %p1064_p3 = scmp.lt.u32.totalorder %s1060_s25, %s1283_s2 }
  0x29   :  { %p1066_p4 = pnand %p1064_p3, %p1061_p2 }
  0x2b   :  { %1069 = shalt.err (!%p1066_p4)
}
  0x2c   :  { %s1070_s0 = scalar_lea.vmem %s44_s19, 1024  ;;  %p1075_p6 = scmp.lt.s32.totalorder %s44_s19, %s44_s19 }
  0x2d   :  { %p1071_p5 = scmp.ne.s32.totalorder %s44_s19, %s1070_s0  ;;  %p1076_p7 = scmp.lt.s32.totalorder %s1070_s0, %s1070_s0 }
  0x2f   :  { %p1077_p8 = por %p1076_p7, %p1075_p6 }
  0x31   :  { %p1078_p9 = pnand %p1077_p8, %p1071_p5 }
  0x33   :  { %1081 = shalt.err (!%p1078_p9)
}
  0x34   :  { %49 = dma.hbm_to_vmem [thread:$0]  %s1283_s2, 1024, %s44_s19, [#allocation6], %s1136_s30, %s1136_s30, %s1137_s6  }
  0x35   :  { %s1082_s10 = scalar_lea.hbm %s1284_s3, 2048 }
  0x36   :  { %p1083_p10 = scmp.ne.s32.totalorder %s1284_s3, %s1082_s10  ;;  %p1086_p11 = scmp.lt.u32.totalorder %s1082_s10, %s1284_s3 }
  0x38   :  { %p1088_p12 = pnand %p1086_p11, %p1083_p10 }
  0x3a   :  { %1091 = shalt.err (!%p1088_p12)
}
  0x3b   :  { %s1092_s15 = scalar_lea.vmem %s1208_s22, 2048  ;;  %p1097_p0 = scmp.lt.s32.totalorder %s1208_s22, %s1208_s22 }
  0x3c   :  { %p1093_p13 = scmp.ne.s32.totalorder %s1208_s22, %s1092_s15  ;;  %p1098_p1 = scmp.lt.s32.totalorder %s1092_s15, %s1092_s15 }
  0x3e   :  { %p1099_p2 = por %p1098_p1, %p1097_p0 }
  0x40   :  { %p1100_p3 = pnand %p1099_p2, %p1093_p13 }
  0x42   :  { %1103 = shalt.err (!%p1100_p3)
}
  0x43   :  { %61 = dma.hbm_to_vmem [thread:$0]  %s1284_s3, 2048, %s1208_s22, [#allocation9], %s1136_s30, %s1136_s30, %s1137_s6  }
  0x44   :  { %1126 = dma.done.wait [#allocation3], 1024  }
  0x45   :  { %1127 = vsyncadd [#allocation3], 4294966272 }
  0x46   :  { %1128 = dma.done.wait [#allocation6], 2048  }
  0x47   :  { %1129 = vsyncadd [#allocation6], 4294965248 }
  0x48   :  { %1130 = dma.done.wait [#allocation9], 2048  }
  0x49   :  { %1131 = vsyncadd [#allocation9], 4294965248  ;;  %v976_v0 = vld [vmem:[#allocation5] sm:$0xff]   ;;  %v977_v1 = vld [vmem:[#allocation5 + $0x8] sm:$0xff]  }
  0x4a   :  { %921 = vmatprep.subr.bf16.mxu0 %v976_v0  ;;  %v978_v2 = vld [vmem:[#allocation5 + $0x10] sm:$0xff]   ;;  %v979_v3 = vld [vmem:[#allocation5 + $0x18] sm:$0xff]   ;;  %v984_v4 = vld [vmem:[#allocation2] sm:$0xff]  }
  0x4b   :  { %922 = vmatpush3.bf16.msra.mxu0 %v976_v0  ;;  %937 = vmatprep.mubr.bf16.mxu0 %v984_v4  ;;  %v980_v5 = vld [vmem:[#allocation5 + $0x20] sm:$0xff]   ;;  %v981_v6 = vld [vmem:[#allocation5 + $0x28] sm:$0xff]   ;;  %v982_v10 = vld [vmem:[#allocation5 + $0x30] sm:$0xff]  }
  0x4c   :  { %923 = vmatprep.subr.bf16.mxu0 %v977_v1  ;;  %v992_v7 = vld [vmem:[#allocation8 + $0x40] sm:$0xff]   ;;  %v994_v9 = vld [vmem:[#allocation8 + $0x48] sm:$0xff]   ;;  %v996_v12 = vld [vmem:[#allocation8 + $0x50] sm:$0xff]  }
  0x4d   :  { %v993_v8 = vld [vmem:[#allocation8] sm:$0xff]   ;;  %953 = vmatprep.subr.bf16.mxu1 %v992_v7  ;;  %v995_v11 = vld [vmem:[#allocation8 + $0x8] sm:$0xff]   ;;  %v983_v13 = vld [vmem:[#allocation5 + $0x38] sm:$0xff]  }
  0x4e   :  { %961 = vmatpush3.bf16.msra.mxu1 %v993_v8  ;;  %v997_v14 = vld [vmem:[#allocation8 + $0x10] sm:$0xff]   ;;  %v998_v15 = vld [vmem:[#allocation8 + $0x58] sm:$0xff]   ;;  %v985_v16 = vld [vmem:[#allocation2 + $0x8] sm:$0xff]  }
  0x4f   :  { %924 = vmatpush3.bf16.msra.mxu0 %v977_v1  ;;  %954 = vmatprep.subr.bf16.mxu1 %v994_v9  ;;  %v999_v17 = vld [vmem:[#allocation8 + $0x18] sm:$0xff]   ;;  %v986_v18 = vld [vmem:[#allocation2 + $0x10] sm:$0xff]   ;;  %v1000_v19 = vld [vmem:[#allocation8 + $0x60] sm:$0xff]  }
  0x50   :  { %925 = vmatprep.subr.bf16.mxu0 %v978_v2  ;;  %v1001_v20 = vld [vmem:[#allocation8 + $0x20] sm:$0xff]   ;;  %v1002_v21 = vld [vmem:[#allocation8 + $0x68] sm:$0xff]   ;;  %v987_v22 = vld [vmem:[#allocation2 + $0x18] sm:$0xff]  }
  0x51   :  { %v1003_v23 = vld [vmem:[#allocation8 + $0x28] sm:$0xff]   ;;  %v988_v24 = vld [vmem:[#allocation2 + $0x20] sm:$0xff]   ;;  %v1004_v25 = vld [vmem:[#allocation8 + $0x70] sm:$0xff]  }
  0x52   :  { %962 = vmatpush3.bf16.msra.mxu1 %v995_v11  ;;  %v1005_v26 = vld [vmem:[#allocation8 + $0x30] sm:$0xff]   ;;  %v989_v27 = vld [vmem:[#allocation2 + $0x28] sm:$0xff]   ;;  %v991_v29 = vld [vmem:[#allocation2 + $0x38] sm:$0xff]  }
  0x53   :  { %926 = vmatpush3.bf16.msra.mxu0 %v978_v2  ;;  %955 = vmatprep.subr.bf16.mxu1 %v996_v12  ;;  %v990_v28 = vld [vmem:[#allocation2 + $0x30] sm:$0xff]   ;;  %v1006_v30 = vld [vmem:[#allocation8 + $0x78] sm:$0xff]   ;;  %v1008_v32 = vld [vmem:[#allocation7] sm:$0xff]  }
  0x54   :  { %927 = vmatprep.subr.bf16.mxu0 %v979_v3  ;;  %v1007_v31 = vld [vmem:[#allocation8 + $0x38] sm:$0xff]   ;;  %v1010_v33 = vld [vmem:[#allocation7 + $0x10] sm:$0xff]   ;;  %v1009_v39 = vld [vmem:[#allocation7 + $0x8] sm:$0xff]  }
  0x55   :  { %557 = vmatprep.mubr.bf16.mxu1 %v1010_v33  ;;  %v1011_v46 = vld [vmem:[#allocation7 + $0x18] sm:$0xff]   ;;  %v1012_v53 = vld [vmem:[#allocation7 + $0x20] sm:$0xff]   ;;  %v1013_v58 = vld [vmem:[#allocation7 + $0x28] sm:$0xff]  }
  0x56   :  { %963 = vmatpush3.bf16.msra.mxu1 %v997_v14  ;;  %v1014_v62 = vld [vmem:[#allocation7 + $0x30] sm:$0xff]   ;;  %v1015_v63 = vld [vmem:[#allocation7 + $0x38] sm:$0xff]   ;;  %v1248_v1 = vld [vmem:[%s1285_s4] ss:$0 sm:$0xff]  ;;  %s1140_s4 = smov [#allocation10]  }
  0x57   :  { %928 = vmatpush3.bf16.msra.mxu0 %v979_v3  ;;  %956 = vmatprep.subr.bf16.mxu1 %v998_v15  ;;  %s707_s17 = sshll.u32 %s1140_s4, 4  ;;  %s708_s17 = int_to_ptr.vmem [resolvable:$true] %s707_s17 }
  0x58   :  { %929 = vmatprep.subr.bf16.mxu0 %v980_v5  ;;  %s1104_s18 = scalar_lea.vmem %s708_s17, 1024  ;;  %p1109_p5 = scmp.lt.s32.totalorder %s708_s17, %s708_s17 }
  0x59   :  { %p1105_p4 = scmp.ne.s32.totalorder %s708_s17, %s1104_s18  ;;  %p1110_p6 = scmp.lt.s32.totalorder %s1104_s18, %s1104_s18 }
  0x5a   :  { %964 = vmatpush3.bf16.msra.mxu1 %v999_v17 }
  0x5b   :  { %930 = vmatpush3.bf16.msra.mxu0 %v980_v5  ;;  %957 = vmatprep.subr.bf16.mxu1 %v1000_v19  ;;  %p1111_p7 = por %p1110_p6, %p1109_p5 }
  0x5c   :  { %931 = vmatprep.subr.bf16.mxu0 %v981_v6 }
  0x5d   :  { %p1112_p8 = pnand %p1111_p7, %p1105_p4 }
  0x5e   :  { %965 = vmatpush3.bf16.msra.mxu1 %v1001_v20 }
  0x5f   :  { %932 = vmatpush3.bf16.msra.mxu0 %v981_v6  ;;  %958 = vmatprep.subr.bf16.mxu1 %v1002_v21 }
  0x60   :  { %933 = vmatprep.subr.bf16.mxu0 %v982_v10 }
  0x62   :  { %966 = vmatpush3.bf16.msra.mxu1 %v1003_v23 }
  0x63   :  { %934 = vmatpush3.bf16.msra.mxu0 %v982_v10  ;;  %959 = vmatprep.subr.bf16.mxu1 %v1004_v25 }
  0x64   :  { %935 = vmatprep.subr.bf16.mxu0 %v983_v13 }
  0x66   :  { %967 = vmatpush3.bf16.msra.mxu1 %v1005_v26 }
  0x67   :  { %936 = vmatpush3.bf16.msra.mxu0 %v983_v13  ;;  %960 = vmatprep.subr.bf16.mxu1 %v1006_v30 }
  0x68   :  { %857 = vmatprep.subr.bf16.mxu0 %v992_v7 }
  0x6a   :  { %938 = vmatmul.mubr.bf16.vlgmr.msra.gmra.mrb[0].mxu0 %v985_v16  ;;  %968 = vmatpush3.bf16.msra.mxu1 %v1007_v31 }
  0x6b   :  { %941 = vmatprep.mubr.bf16.mxu0 %v986_v18  ;;  %858 = vmatpush3.bf16.msra.mxu0 %v993_v8 }
  0x6c   :  { %859 = vmatprep.subr.bf16.mxu0 %v994_v9 }
  0x6f   :  { %860 = vmatpush3.bf16.msra.mxu0 %v995_v11 }
  0x70   :  { %861 = vmatprep.subr.bf16.mxu0 %v996_v12 }
  0x72   :  { %942 = vmatmul.mubr.bf16.gmra.mrb[4].mxu0 %v987_v22 }
  0x73   :  { %945 = vmatprep.mubr.bf16.mxu0 %v988_v24  ;;  %862 = vmatpush3.bf16.msra.mxu0 %v997_v14 }
  0x74   :  { %863 = vmatprep.subr.bf16.mxu0 %v998_v15 }
  0x77   :  { %864 = vmatpush3.bf16.msra.mxu0 %v999_v17 }
  0x78   :  { %865 = vmatprep.subr.bf16.mxu0 %v1000_v19 }
  0x7a   :  { %946 = vmatmul.mubr.bf16.gmra.mrb[8].mxu0 %v989_v27 }
  0x7b   :  { %949 = vmatprep.mubr.bf16.mxu0 %v990_v28  ;;  %866 = vmatpush3.bf16.msra.mxu0 %v1001_v20 }
  0x7c   :  { %867 = vmatprep.subr.bf16.mxu0 %v1002_v21 }
  0x7f   :  { %868 = vmatpush3.bf16.msra.mxu0 %v1003_v23 }
  0x80   :  { %869 = vmatprep.subr.bf16.mxu0 %v1004_v25 }
  0x82   :  { %950 = vmatmul.mubr.bf16.gmra.mrb[12].mxu0 %v991_v29 }
  0x83   :  { %870 = vmatpush3.bf16.msra.mxu0 %v1005_v26  ;;  %541 = vmatprep.mubr.bf16.mxu0 %v1008_v32 }
  0x84   :  { %871 = vmatprep.subr.bf16.mxu0 %v1006_v30 }
  0x87   :  { %872 = vmatpush3.bf16.msra.mxu0 %v1007_v31 }
 0x13d   :  { %v939_v34 = vpop.f32.mrb[0].mxu0 }
 0x13e   :  { %v239_v35 = vpop.f32.mrb[1].mxu0 }
 0x13f   :  { %v940_v36 = vpop.f32.mrb[2].mxu0 }
 0x140   :  { %v303_v37 = vpack.c.bf16 %v940_v36, %v939_v34  ;;  %v242_v38 = vpop.f32.mrb[3].mxu0 }
 0x141   :  { %v302_v40 = vpack.c.bf16 %v242_v38, %v239_v35 }
 0x143   :  { %542 = vmatmul.mubr.bf16.vlgmr.msra.gmra.mrb[16].mxu0 %v302_v40 }
 0x144   :  { %549 = vmatprep.mubr.bf16.mxu0 %v1009_v39 }
 0x145   :  { %v943_v41 = vpop.f32.mrb[4].mxu0 }
 0x146   :  { %v255_v42 = vpop.f32.mrb[5].mxu0 }
 0x147   :  { %v944_v43 = vpop.f32.mrb[6].mxu0 }
 0x148   :  { %v305_v44 = vpack.c.bf16 %v944_v43, %v943_v41  ;;  %v258_v45 = vpop.f32.mrb[7].mxu0 }
 0x149   :  { %v304_v47 = vpack.c.bf16 %v258_v45, %v255_v42 }
 0x14b   :  { %550 = vmatmul.mubr.bf16.gmra.mrb[20].mxu0 %v303_v37  ;;  %558 = vmatmul.mubr.bf16.vlgmr.msra.gmra.mrb[0].mxu1 %v304_v47 }
 0x14c   :  { %565 = vmatprep.mubr.bf16.mxu1 %v1011_v46 }
 0x14d   :  { %v947_v48 = vpop.f32.mrb[8].mxu0 }
 0x14e   :  { %v271_v49 = vpop.f32.mrb[9].mxu0 }
 0x14f   :  { %v948_v50 = vpop.f32.mrb[10].mxu0 }
 0x150   :  { %v307_v51 = vpack.c.bf16 %v948_v50, %v947_v48  ;;  %v274_v52 = vpop.f32.mrb[11].mxu0 }
 0x151   :  { %v306_v54 = vpack.c.bf16 %v274_v52, %v271_v49 }
 0x153   :  { %566 = vmatmul.mubr.bf16.gmra.mrb[4].mxu1 %v305_v44 }
 0x154   :  { %573 = vmatprep.mubr.bf16.mxu1 %v1012_v53 }
 0x155   :  { %v951_v55 = vpop.f32.mrb[12].mxu0 }
 0x156   :  { %v287_v56 = vpop.f32.mrb[13].mxu0 }
 0x157   :  { %v952_v57 = vpop.f32.mrb[14].mxu0 }
 0x158   :  { %v309_v59 = vpack.c.bf16 %v952_v57, %v951_v55  ;;  %v290_v60 = vpop.f32.mrb[15].mxu0 }
 0x159   :  { %v308_v61 = vpack.c.bf16 %v290_v60, %v287_v56 }
 0x15b   :  { %574 = vmatmul.mubr.bf16.gmra.mrb[8].mxu1 %v306_v54 }
 0x15c   :  { %581 = vmatprep.mubr.bf16.mxu1 %v1013_v58 }
 0x163   :  { %582 = vmatmul.mubr.bf16.gmra.mrb[12].mxu1 %v307_v51 }
 0x164   :  { %589 = vmatprep.mubr.bf16.mxu1 %v1014_v62 }
 0x16b   :  { %590 = vmatmul.mubr.bf16.gmra.mrb[16].mxu1 %v308_v61 }
 0x16c   :  { %597 = vmatprep.mubr.bf16.mxu1 %v1015_v63 }
 0x173   :  { %598 = vmatmul.mubr.bf16.gmra.mrb[20].mxu1 %v309_v59 }
 0x216   :  { %v873_v0 = vpop.f32.mrb[16].mxu0 }
 0x217   :  { %v874_v2 = vpop.f32.mrb[17].mxu0 }
 0x218   :  { %v875_v3 = vadd.f32 %v874_v2, %v873_v0  ;;  %v876_v4 = vpop.f32.mrb[18].mxu0 }
 0x219   :  { %v877_v5 = vpop.f32.mrb[19].mxu0 }
 0x21a   :  { %v544_v6 = vadd.f32 %v875_v3, %v1248_v1  ;;  %v878_v7 = vadd.f32 %v877_v5, %v876_v4 }
 0x21c   :  { %v547_v8 = vadd.f32 %v878_v7, %v1248_v1  ;;  %v606_v9 = vmax.f32 %v544_v6, 0.0 }
 0x21e   :  { %v607_v10 = vmax.f32 %v547_v8, 0.0  ;;  %v879_v11 = vpop.f32.mrb[20].mxu0  ;;  %v885_v12 = vpop.f32.mrb[0].mxu1 }
 0x21f   :  { %v880_v13 = vpop.f32.mrb[21].mxu0  ;;  %v886_v14 = vpop.f32.mrb[1].mxu1 }
 0x220   :  { %v797_v15 = vpack.c.bf16 %v607_v10, %v606_v9  ;;  %v881_v16 = vadd.f32 %v880_v13, %v879_v11  ;;  %v887_v17 = vadd.f32 %v886_v14, %v885_v12  ;;  %v882_v18 = vpop.f32.mrb[22].mxu0  ;;  %v888_v19 = vpop.f32.mrb[2].mxu1 }
 0x221   :  { %v883_v20 = vpop.f32.mrb[23].mxu0  ;;  %v889_v21 = vpop.f32.mrb[3].mxu1 }
 0x222   :  { %798 = vst [vmem:[#allocation10] sm:$0xff] %v797_v15   ;;  %v552_v22 = vadd.f32 %v881_v16, %v1248_v1  ;;  %v560_v23 = vadd.f32 %v887_v17, %v1248_v1  ;;  %v884_v24 = vadd.f32 %v883_v20, %v882_v18  ;;  %v890_v25 = vadd.f32 %v889_v21, %v888_v19 }
 0x224   :  { %v555_v26 = vadd.f32 %v884_v24, %v1248_v1  ;;  %v563_v27 = vadd.f32 %v890_v25, %v1248_v1  ;;  %v608_v28 = vmax.f32 %v552_v22, 0.0  ;;  %v610_v29 = vmax.f32 %v560_v23, 0.0 }
 0x226   :  { %v609_v30 = vmax.f32 %v555_v26, 0.0  ;;  %v611_v31 = vmax.f32 %v563_v27, 0.0  ;;  %v891_v32 = vpop.f32.mrb[4].mxu1 }
 0x227   :  { %v892_v33 = vpop.f32.mrb[5].mxu1 }
 0x228   :  { %v802_v34 = vpack.c.bf16 %v609_v30, %v608_v28  ;;  %v807_v35 = vpack.c.bf16 %v611_v31, %v610_v29  ;;  %v893_v36 = vadd.f32 %v892_v33, %v891_v32  ;;  %v894_v37 = vpop.f32.mrb[6].mxu1 }
 0x229   :  { %v895_v38 = vpop.f32.mrb[7].mxu1 }
 0x22a   :  { %834 = vst [vmem:[#allocation10 + $0x8] sm:$0xff] %v802_v34   ;;  %835 = vst [vmem:[#allocation10 + $0x10] sm:$0xff] %v807_v35   ;;  %v568_v39 = vadd.f32 %v893_v36, %v1248_v1  ;;  %v896_v40 = vadd.f32 %v895_v38, %v894_v37 }
 0x22c   :  { %v571_v41 = vadd.f32 %v896_v40, %v1248_v1  ;;  %v612_v42 = vmax.f32 %v568_v39, 0.0 }
 0x22e   :  { %v613_v43 = vmax.f32 %v571_v41, 0.0  ;;  %v897_v44 = vpop.f32.mrb[8].mxu1 }
 0x22f   :  { %v898_v45 = vpop.f32.mrb[9].mxu1 }
 0x230   :  { %v812_v46 = vpack.c.bf16 %v613_v43, %v612_v42  ;;  %v899_v47 = vadd.f32 %v898_v45, %v897_v44  ;;  %v900_v48 = vpop.f32.mrb[10].mxu1 }
 0x231   :  { %v901_v49 = vpop.f32.mrb[11].mxu1 }
 0x232   :  { %836 = vst [vmem:[#allocation10 + $0x18] sm:$0xff] %v812_v46   ;;  %v576_v50 = vadd.f32 %v899_v47, %v1248_v1  ;;  %v902_v51 = vadd.f32 %v901_v49, %v900_v48 }
 0x234   :  { %v579_v52 = vadd.f32 %v902_v51, %v1248_v1  ;;  %v614_v53 = vmax.f32 %v576_v50, 0.0 }
 0x236   :  { %v615_v54 = vmax.f32 %v579_v52, 0.0  ;;  %v903_v55 = vpop.f32.mrb[12].mxu1 }
 0x237   :  { %v904_v56 = vpop.f32.mrb[13].mxu1 }
 0x238   :  { %v817_v57 = vpack.c.bf16 %v615_v54, %v614_v53  ;;  %v905_v58 = vadd.f32 %v904_v56, %v903_v55  ;;  %v906_v59 = vpop.f32.mrb[14].mxu1 }
 0x239   :  { %v907_v60 = vpop.f32.mrb[15].mxu1 }
 0x23a   :  { %837 = vst [vmem:[#allocation10 + $0x20] sm:$0xff] %v817_v57   ;;  %v584_v61 = vadd.f32 %v905_v58, %v1248_v1  ;;  %v908_v62 = vadd.f32 %v907_v60, %v906_v59 }
 0x23c   :  { %v587_v63 = vadd.f32 %v908_v62, %v1248_v1  ;;  %v616_v0 = vmax.f32 %v584_v61, 0.0 }
 0x23e   :  { %v617_v2 = vmax.f32 %v587_v63, 0.0  ;;  %v909_v3 = vpop.f32.mrb[16].mxu1 }
 0x23f   :  { %v910_v4 = vpop.f32.mrb[17].mxu1 }
 0x240   :  { %v822_v5 = vpack.c.bf16 %v617_v2, %v616_v0  ;;  %v911_v6 = vadd.f32 %v910_v4, %v909_v3  ;;  %v912_v7 = vpop.f32.mrb[18].mxu1 }
 0x241   :  { %v913_v8 = vpop.f32.mrb[19].mxu1 }
 0x242   :  { %838 = vst [vmem:[#allocation10 + $0x28] sm:$0xff] %v822_v5   ;;  %v592_v9 = vadd.f32 %v911_v6, %v1248_v1  ;;  %v914_v10 = vadd.f32 %v913_v8, %v912_v7 }
 0x244   :  { %v595_v11 = vadd.f32 %v914_v10, %v1248_v1  ;;  %v618_v12 = vmax.f32 %v592_v9, 0.0 }
 0x246   :  { %v619_v13 = vmax.f32 %v595_v11, 0.0  ;;  %v915_v14 = vpop.f32.mrb[20].mxu1 }
 0x247   :  { %v916_v15 = vpop.f32.mrb[21].mxu1 }
 0x248   :  { %v827_v16 = vpack.c.bf16 %v619_v13, %v618_v12  ;;  %v917_v17 = vadd.f32 %v916_v15, %v915_v14  ;;  %v918_v18 = vpop.f32.mrb[22].mxu1 }
 0x249   :  { %v919_v19 = vpop.f32.mrb[23].mxu1 }
 0x24a   :  { %839 = vst [vmem:[#allocation10 + $0x30] sm:$0xff] %v827_v16   ;;  %v600_v20 = vadd.f32 %v917_v17, %v1248_v1  ;;  %v920_v21 = vadd.f32 %v919_v19, %v918_v18 }
 0x24c   :  { %v603_v22 = vadd.f32 %v920_v21, %v1248_v1  ;;  %v620_v23 = vmax.f32 %v600_v20, 0.0 }
 0x24e   :  { %v621_v24 = vmax.f32 %v603_v22, 0.0 }
 0x250   :  { %v832_v25 = vpack.c.bf16 %v621_v24, %v620_v23 }
 0x252   :  { %840 = vst [vmem:[#allocation10 + $0x38] sm:$0xff] %v832_v25  }
 0x253   :  { %1115 = shalt.err (!%p1112_p8)
}
 0x254   :  { %s1116_s22 = scalar_lea.hbm %s1286_s5, 1024 }
 0x255   :  { %p1117_p9 = scmp.ne.s32.totalorder %s1286_s5, %s1116_s22  ;;  %p1120_p10 = scmp.lt.u32.totalorder %s1116_s22, %s1286_s5 }
 0x257   :  { %p1122_p11 = pnand %p1120_p10, %p1117_p9 }
 0x259   :  { %1125 = shalt.err (!%p1122_p11)
}
 0x25a   :  { %713 = dma.vmem_to_hbm [thread:$0]  %s708_s17, 1024, %s1286_s5, [#allocation4], %s1136_s30, %s1136_s30, %s1137_s6  }
 0x25b   :  { %1132 = dma.done.wait [#allocation4], 1024  }
 0x25c   :  { %1133 = vsyncadd [#allocation4], 4294966272 }
 0x25d   :  { %717 = vsyncpa [#allocation3], 1 }
 0x25e   :  { %718 = vsyncpa [#allocation6], 1 }
 0x25f   :  { %719 = vsyncpa [#allocation9], 1 }
 0x260   :  { %720 = vsyncpa [#allocation4], 1 }

</bundles_post_ra>
